<compile_context>
chip_gen: v5e
topology: v5e:2x2
jax: 0.10.0
libtpu: 0.0.40
codegen_flags: <defaults>
</compile_context>

<pallas_src>
import jax
import jax.numpy as jnp
from jax.experimental import pallas as pl
from jax.experimental.pallas import tpu as pltpu

IN_F = 64
OUT_F = 64
TM_MAX = 512  # max rows per grid step (sublane-aligned); tiny VMEM footprint


def _round_up(x, m):
    return (x + m - 1) // m * m


def linear_hardsigmoid_kernel(x_ref, w_ref, b_ref, o_ref):
    # Hard-sigmoid affine is already folded into w/b on the host:
    #   out = clip(x @ (W.T/6) + (b+3)/6, 0, 1)
    y = jnp.dot(x_ref[...], w_ref[...], preferred_element_type=jnp.float32)
    o_ref[...] = jnp.clip(y + b_ref[...], 0.0, 1.0).astype(o_ref.dtype)


def prepare_params(w, b):
    """One-time host prep.
    w: (OUT_F, IN_F) PyTorch-layout weight;  b: (OUT_F,) bias.
    Returns hard-sigmoid-folded params at their natural (unpadded) shapes:
      w_eff: (IN_F, OUT_F) = W.T / 6,   b_eff: (1, OUT_F) = (b + 3) / 6.
    """
    w_eff = (w.T.astype(jnp.float32)) * (1.0 / 6.0)
    b_eff = ((b.astype(jnp.float32) + 3.0) * (1.0 / 6.0)).reshape(1, OUT_F)
    return w_eff, b_eff


def model_forward(x, w_eff, b_eff):
    """x: (B, IN_F) f32.  Returns (B, OUT_F) = clip(x @ W.T + b + 3, 0, 6) / 6."""
    B = x.shape[0]
    x = x.astype(jnp.float32)

    # Batch tile size: single small step for tiny B; for larger B use up to
    # TM_MAX rows but keep at least 2 grid steps so v7x megacore can split
    # the "parallel" batch axis across its two TensorCores.
    if B <= 8:
        TM = 8  # single (8,128)-aligned step; launch overhead dominates anyway
    else:
        TM = min(TM_MAX, _round_up(pl.cdiv(B, 2), 8))
    grid = (pl.cdiv(B, TM),)

    out = pl.pallas_call(
        linear_hardsigmoid_kernel,
        out_shape=jax.ShapeDtypeStruct((B, OUT_F), jnp.float32),
        grid=grid,
        in_specs=[
            # Activation tile marches over the batch axis; last dim == full
            # array dim (64), so no K padding is needed.  The ragged final
            # block (when TM does not divide B) is handled by Pallas: rows
            # are independent and out-of-range output rows are discarded.
            pl.BlockSpec((TM, IN_F), lambda i: (i, 0)),
            # Weight / bias: constant block index -> DMA'd once, resident in
            # VMEM across all grid steps.
            pl.BlockSpec((IN_F, OUT_F), lambda i: (0, 0)),
            pl.BlockSpec((1, OUT_F), lambda i: (0, 0)),
        ],
        # Output emitted at its natural (B, 64) shape: no N padding, no
        # host-side slice afterwards.
        out_specs=pl.BlockSpec((TM, OUT_F), lambda i: (i, 0)),
        compiler_params=pltpu.CompilerParams(
            # Batch tiles are independent: shard across both TCs on v7x
            # (no effect on single-TC v5e/v6e).
            dimension_semantics=("parallel",),
        ),
    )(x, w_eff, b_eff)
    return out


if __name__ == "__main__":
    key = jax.random.PRNGKey(0)
    kx, kw, kb, kx2 = jax.random.split(key, 4)

    # Deterministic Linear(64, 64) params, PyTorch layout: weight (out,in), bias (out,)
    bound = 1.0 / jnp.sqrt(jnp.float32(IN_F))
    w = jax.random.uniform(kw, (OUT_F, IN_F), jnp.float32, -bound, bound)
    b = jax.random.uniform(kb, (OUT_F,), jnp.float32, -bound, bound)
    w_eff, b_eff = prepare_params(w, b)

    def ref_fn(x):
        return jnp.clip(x @ w.T + b + 3.0, 0.0, 6.0) / 6.0

    fwd = jax.jit(model_forward)

    # Case 1: the module's shape, x1 = torch.randn(1, 64)
    x1 = jax.random.normal(kx, (1, IN_F), dtype=jnp.float32)
    out1 = jax.block_until_ready(fwd(x1, w_eff, b_eff))
    assert out1.shape == (1, OUT_F)
    assert jnp.allclose(out1, ref_fn(x1), atol=1e-5, rtol=1e-5)

    # Case 2: batched path exercising the multi-step grid, resident weight
    # tile, and the ragged final batch block (300 is not a multiple of TM).
    x2 = jax.random.normal(kx2, (300, IN_F), dtype=jnp.float32)
    out2 = jax.block_until_ready(fwd(x2, w_eff, b_eff))
    assert out2.shape == (300, OUT_F)
    assert jnp.allclose(out2, ref_fn(x2), atol=1e-5, rtol=1e-5)

    print("KERNEL_OK")
</pallas_src>

<mosaic_0001>
module attributes {stable_mosaic.version = 11 : i64} {
  func.func @linear_hardsigmoid_kernel(%arg0: i32, %arg1: memref<8x64xf32, #tpu.memory_space<vmem>>, %arg2: memref<64x64xf32, #tpu.memory_space<vmem>>, %arg3: memref<1x64xf32, #tpu.memory_space<vmem>>, %arg4: memref<8x64xf32, #tpu.memory_space<vmem>>) attributes {dimension_semantics = [#tpu.dimension_semantics<parallel>], iteration_bounds = array<i64: 1>, scalar_prefetch = 0 : i64, scratch_operands = 0 : i64, tpu.core_type = #tpu.core_type<tc>, window_params = [{transform_indices = @transform_0, window_bounds = array<i64: 8, 64>}, {pipeline_mode = #tpu.pipeline_mode<synchronous>, transform_indices = @transform_1, window_bounds = array<i64: 64, 64>}, {pipeline_mode = #tpu.pipeline_mode<synchronous>, transform_indices = @transform_2, window_bounds = array<i64: 1, 64>}, {transform_indices = @transform_3, window_bounds = array<i64: 8, 64>}]} {
    %c0 = arith.constant 0 : index
    %c0_0 = arith.constant 0 : index
    %0 = vector.load %arg1[%c0, %c0_0] : memref<8x64xf32, #tpu.memory_space<vmem>>, vector<8x64xf32>
    %c0_1 = arith.constant 0 : index
    %c0_2 = arith.constant 0 : index
    %1 = vector.load %arg2[%c0_1, %c0_2] : memref<64x64xf32, #tpu.memory_space<vmem>>, vector<64x64xf32>
    %cst = arith.constant dense<0.000000e+00> : vector<8x64xf32>
    %2 = tpu.matmul %0, %1, %cst {dimension_numbers = #tpu.dot_dimension_numbers<[1], [0], [0], [1], [0, 0, 1, 1], [], []>} : vector<8x64xf32>, vector<64x64xf32>, vector<8x64xf32> -> vector<8x64xf32>
    %c0_3 = arith.constant 0 : index
    %c0_4 = arith.constant 0 : index
    %3 = vector.load %arg3[%c0_3, %c0_4] : memref<1x64xf32, #tpu.memory_space<vmem>>, vector<1x64xf32>
    %4 = vector.broadcast %3 : vector<1x64xf32> to vector<8x64xf32>
    %5 = arith.addf %2, %4 : vector<8x64xf32>
    %cst_5 = arith.constant 0.000000e+00 : f32
    %cst_6 = arith.constant 1.000000e+00 : f32
    %6 = vector.broadcast %cst_5 : f32 to vector<8x64xf32>
    %7 = arith.maximumf %6, %5 : vector<8x64xf32>
    %8 = vector.broadcast %cst_6 : f32 to vector<8x64xf32>
    %9 = arith.minimumf %8, %7 : vector<8x64xf32>
    %c0_7 = arith.constant 0 : index
    %c0_8 = arith.constant 0 : index
    %10 = vector.load %arg4[%c0_7, %c0_8] : memref<8x64xf32, #tpu.memory_space<vmem>>, vector<8x64xf32>
    tpu.vector_store %arg4[%c0_7, %c0_8], %9 {strides = array<i32>} : memref<8x64xf32, #tpu.memory_space<vmem>>, vector<8x64xf32>,
    return
  }
  func.func @transform_0(%arg0: i32) -> (i32, i32) {
    %c0_i32 = arith.constant 0 : i32
    %c0_i32_0 = arith.constant 0 : i32
    return %arg0, %c0_i32 : i32, i32
  }
  func.func @transform_1(%arg0: i32) -> (i32, i32) {
    %c0_i32 = arith.constant 0 : i32
    %c0_i32_0 = arith.constant 0 : i32
    %c0_i32_1 = arith.constant 0 : i32
    return %c0_i32, %c0_i32_0 : i32, i32
  }
  func.func @transform_2(%arg0: i32) -> (i32, i32) {
    %c0_i32 = arith.constant 0 : i32
    %c0_i32_0 = arith.constant 0 : i32
    %c0_i32_1 = arith.constant 0 : i32
    return %c0_i32, %c0_i32_0 : i32, i32
  }
  func.func @transform_3(%arg0: i32) -> (i32, i32) {
    %c0_i32 = arith.constant 0 : i32
    %c0_i32_0 = arith.constant 0 : i32
    return %arg0, %c0_i32 : i32, i32
  }
}

</mosaic_0001>

<bundles_post_ra>
// kernel: model_forward.1
= control target key start
LH: loop header
LB: loop body
LE: loop exit
PB: predicated region body
PF: predicated region fallthrough
CT: control target
= control target key end

     0   :  { %8 = vsyncpa [#allocation3], 0  ;;  %s239_s0 = inlined_call_operand.hbm [shape: f32[1,64], index: 0, kind: input, shape index: {}]   ;;  %s240_s1 = inlined_call_operand.hbm [shape: f32[64,64], index: 1, kind: input, shape index: {}]   ;;  %s241_s2 = inlined_call_operand.vmem [shape: f32[1,64], index: 2, kind: input, shape index: {}]   ;;  %s242_s3 = inlined_call_operand.hbm [shape: f32[1,64], index: 3, kind: output, shape index: {}]  }
   0x1   :  { %9 = vsyncpa [#allocation6], 0 }
   0x2   :  { %10 = vsyncpa [#allocation4], 0 }
   0x3   :  { %14 = vsyncadd [#allocation3], 112  ;;  %s15_s14 = sshll.u32 %s239_s0, 4  ;;  %s194_s15 = smov [#allocation2]   ;;  %s16_s14 = int_to_ptr.hbm [resolvable:$true] %s15_s14 }
   0x4   :  { %s17_s16 = sshll.u32 %s194_s15, 4  ;;  %s28_s19 = sshll.u32 %s240_s1, 4  ;;  %s18_s16 = int_to_ptr.vmem [resolvable:$true] %s17_s16  ;;  %s29_s19 = int_to_ptr.hbm [resolvable:$true] %s28_s19 }
   0x5   :  { %s195_s20 = smov 16   ;;  %s196_s21 = smov 1  }
   0x6   :  { %23 = dma.hbm_to_vmem [thread:$0]  %s16_s14, 16, %s18_s16, [#allocation3], %s195_s20, %s195_s20, %s196_s21  }
   0x7   :  { %s197_s22 = smov [#allocation5]   ;;  %s198_s24 = smov 128  }
   0x8   :  { %s30_s23 = sshll.u32 %s197_s22, 4  ;;  %s199_s0 = smov 8   ;;  %s31_s23 = int_to_ptr.vmem [resolvable:$true] %s30_s23 }
   0x9   :  { %36 = dma.hbm_to_vmem [thread:$0]  %s29_s19, 1024, %s31_s23, [#allocation6], %s198_s24, %s198_s24, %s199_s0  }
   0xa   :  { %188 = dma.done.wait [#allocation3], 128  }
   0xb   :  { %189 = vsyncadd [#allocation3], 4294967168 }
   0xc   :  { %190 = dma.done.wait [#allocation6], 1024  }
   0xd   :  { %191 = vsyncadd [#allocation6], 4294966272  ;;  %v55_v0 = vld [vmem:[#allocation5 + $0x38] sm:$0xff]  ;;  %v54_v1 = vld [vmem:[#allocation5 + $0x30] sm:$0xff]  ;;  %vm60_vm0 = vcmask 523264  }
   0xe   :  { %72 = vmatpush.msra.mxu0 %v55_v0  ;;  %v53_v2 = vld [vmem:[#allocation5 + $0x28] sm:$0xff]  ;;  %v52_v3 = vld [vmem:[#allocation5 + $0x20] sm:$0xff]  ;;  %v51_v4 = vld [vmem:[#allocation5 + $0x18] sm:$0xff] }
   0xf   :  { %v50_v5 = vld [vmem:[#allocation5 + $0x10] sm:$0xff]  ;;  %v49_v6 = vld [vmem:[#allocation5 + $0x8] sm:$0xff]  ;;  %v48_v7 = vld [vmem:[#allocation5] sm:$0xff] }
  0x10   :  { %73 = vmatpush.msra.mxu0 %v54_v1  ;;  %v47_v8 = vld [vmem:[#allocation2] sm:$0xff] }
  0x11   :  { %v115_v9 = vld [vmem:[%s241_s2] ss:$0 sm:$0xff] }
  0x12   :  { %74 = vmatpush.msra.mxu0 %v53_v2 }
  0x14   :  { %75 = vmatpush.msra.mxu0 %v52_v3 }
  0x16   :  { %76 = vmatpush.msra.mxu0 %v51_v4 }
  0x18   :  { %77 = vmatpush.msra.mxu0 %v50_v5 }
  0x1a   :  { %78 = vmatpush.msra.mxu0 %v49_v6 }
  0x1c   :  { %79 = vmatpush.msra.mxu0 %v48_v7 }
  0x1d   :  { %107 = vmatmul.msk.f32.vlgmr.msra.gmra.mxu0 %vm60_vm0, %v47_v8 }
  0x9a   :  { %v81_v10 = vpop.f32.mrf.mxu0 }
  0x9b   :  { %v82_v11 = vadd.f32 %v115_v9, %v81_v10 }
  0x9d   :  { %v84_v12 = vmax.f32 %v82_v11, 0.0 }
  0x9f   :  { %v85_v13 = vmin.f32 %v84_v12, 1.0 }
  0xa1   :  { %86 = vst.msk [vmem:[#allocation7] sm:$0xff] %vm60_vm0, %v85_v13 }
  0xa2   :  { %90 = vsyncadd [#allocation4], 112  ;;  %s93_s28 = sshll.u32 %s242_s3, 4  ;;  %s200_s29 = smov [#allocation7]   ;;  %s94_s28 = int_to_ptr.hbm [resolvable:$true] %s93_s28 }
  0xa3   :  { %s91_s30 = sshll.u32 %s200_s29, 4  ;;  %s92_s30 = int_to_ptr.vmem [resolvable:$true] %s91_s30 }
  0xa4   :  { %99 = dma.vmem_to_hbm [thread:$0]  %s92_s30, 16, %s94_s28, [#allocation4], %s195_s20, %s195_s20, %s196_s21  }
  0xa5   :  { %192 = dma.done.wait [#allocation4], 128  }
  0xa6   :  { %193 = vsyncadd [#allocation4], 4294967168 }
  0xa7   :  { %104 = vsyncpa [#allocation3], 1 }
  0xa8   :  { %105 = vsyncpa [#allocation6], 1 }
  0xa9   :  { %106 = vsyncpa [#allocation4], 1 }

</bundles_post_ra>
